<compile_context>
chip_gen: v7x
topology: tpu7x:2x2x1
jax: 0.10.0
libtpu: 0.0.40
codegen_flags: <defaults>
</compile_context>

<pallas_src>
import jax
import jax.numpy as jnp
from jax.experimental import pallas as pl
from jax.experimental.pallas import tpu as pltpu


def _round_up(x, m):
    return (x + m - 1) // m * m


def _pooler_kernel(x_ref, w_ref, b_ref, o_ref):
    # y = x @ W^T + b : contract x's dim 1 with W's dim 1 (PyTorch Linear
    # layout), accumulate in f32 on the MXU.
    acc = jax.lax.dot_general(
        x_ref[...], w_ref[...],
        dimension_numbers=(((1,), (1,)), ((), ())),
        preferred_element_type=jnp.float32)
    acc = acc + b_ref[...].astype(jnp.float32)
    o_ref[...] = jnp.tanh(acc).astype(o_ref.dtype)


def bert_pooler(hidden_states, weight, bias, *, block_rows=256,
                matmul_dtype=jnp.bfloat16):
    """BERTPooler forward.

    hidden_states: [B, S, H]; weight: [H, H] (nn.Linear layout, y = x@W^T+b);
    bias: [H].  Returns [B, H] = tanh(dense(hidden_states[:, 0])).
    matmul_dtype: dtype of the MXU operands (None = keep input dtype).
    """
    B, S, H = hidden_states.shape
    out_dtype = hidden_states.dtype

    # First ([CLS]) token of every sequence.
    x = hidden_states[:, 0, :]                     # [B, H]
    w = weight
    if matmul_dtype is not None:
        x = x.astype(matmul_dtype)
        w = w.astype(matmul_dtype)
    b2 = bias.reshape(1, H)

    # Row tile: as big as the (padded) batch, capped at block_rows.
    tb = min(_round_up(B, 8), _round_up(block_rows, 8))
    Bp = _round_up(B, tb)
    if Bp != B:
        x = jnp.pad(x, ((0, Bp - B), (0, 0)))
    grid = (Bp // tb,)

    def _build(single_buffer_invariants):
        def inv_spec(shape):
            if single_buffer_invariants:
                # Grid-invariant operands: one VMEM buffer is enough.
                return pl.BlockSpec(shape, lambda i: (0, 0),
                                    pipeline_mode=pl.Buffered(1))
            return pl.BlockSpec(shape, lambda i: (0, 0))

        return pl.pallas_call(
            _pooler_kernel,
            out_shape=jax.ShapeDtypeStruct((Bp, H), out_dtype),
            grid_spec=pltpu.PrefetchScalarGridSpec(
                num_scalar_prefetch=0,
                grid=grid,
                in_specs=[
                    pl.BlockSpec((tb, H), lambda i: (i, 0)),   # CLS rows
                    inv_spec((H, H)),                          # weight
                    inv_spec((1, H)),                          # bias
                ],
                out_specs=pl.BlockSpec((tb, H), lambda i: (i, 0)),
            ),
            compiler_params=pltpu.CompilerParams(
                dimension_semantics=("parallel",),
                vmem_limit_bytes=32 * 1024 * 1024,
            ),
        )

    try:
        out = _build(True)(x, w, b2)
    except Exception:
        # TODO(synk): pipeline_mode=pl.Buffered(1) unsupported on this JAX
        # version; fall back to default double-buffering of the invariants.
        out = _build(False)(x, w, b2)

    return out[:B]


def _ref(hidden_states, weight, bias):
    x = hidden_states[:, 0, :]
    return jnp.tanh(x @ weight.T + bias)


if __name__ == "__main__":
    B, S, H = 3, 8, 128   # H lane-aligned; B=3 exercises the padded tail tile
    key = jax.random.PRNGKey(0)
    k1, k2, k3 = jax.random.split(key, 3)

    hidden_states = jax.random.normal(k1, (B, S, H), dtype=jnp.float32)
    # nn.Linear(hidden, hidden): weight [H, H], bias [H]
    weight = jax.random.normal(k2, (H, H), dtype=jnp.float32) * 0.02
    bias = jax.random.normal(k3, (H,), dtype=jnp.float32) * 0.02

    ref = _ref(hidden_states, weight, bias)

    # Default path: bf16 MXU operands, f32 accumulation.
    out_bf16 = jax.block_until_ready(bert_pooler(hidden_states, weight, bias))
    assert out_bf16.shape == (B, H)
    assert jnp.allclose(out_bf16, ref, atol=5e-3, rtol=5e-3), "bf16 matmul mismatch"

    # Exact-precision path (matches the f32 PyTorch module numerics).
    out_f32 = jax.block_until_ready(
        bert_pooler(hidden_states, weight, bias, matmul_dtype=None))
    assert out_f32.shape == (B, H)
    assert jnp.allclose(out_f32, ref, atol=1e-4, rtol=1e-4), "f32 mismatch"

    print("KERNEL_OK")
</pallas_src>

<mosaic_0001>
module attributes {stable_mosaic.version = 11 : i64} {
  func.func @_pooler_kernel(%arg0: i32, %arg1: memref<8x128xbf16, #tpu.memory_space<vmem>>, %arg2: memref<128x128xbf16, #tpu.memory_space<vmem>>, %arg3: memref<1x128xf32, #tpu.memory_space<vmem>>, %arg4: memref<8x128xf32, #tpu.memory_space<vmem>>) attributes {dimension_semantics = [#tpu.dimension_semantics<parallel>], iteration_bounds = array<i64: 1>, scalar_prefetch = 0 : i64, scratch_operands = 0 : i64, tpu.core_type = #tpu.core_type<tc>, window_params = [{transform_indices = @transform_0, window_bounds = array<i64: 8, 128>}, {pipeline_mode = #tpu.pipeline_mode<synchronous>, transform_indices = @transform_1, window_bounds = array<i64: 128, 128>}, {pipeline_mode = #tpu.pipeline_mode<synchronous>, transform_indices = @transform_2, window_bounds = array<i64: 1, 128>}, {transform_indices = @transform_3, window_bounds = array<i64: 8, 128>}]} {
    %c0 = arith.constant 0 : index
    %c0_0 = arith.constant 0 : index
    %0 = vector.load %arg1[%c0, %c0_0] : memref<8x128xbf16, #tpu.memory_space<vmem>>, vector<8x128xbf16>
    %c0_1 = arith.constant 0 : index
    %c0_2 = arith.constant 0 : index
    %1 = vector.load %arg2[%c0_1, %c0_2] : memref<128x128xbf16, #tpu.memory_space<vmem>>, vector<128x128xbf16>
    %cst = arith.constant dense<0.000000e+00> : vector<8x128xf32>
    %2 = tpu.matmul %0, %1, %cst {dimension_numbers = #tpu.dot_dimension_numbers<[1], [1], [0], [0], [0, 0, 1, 0], [], []>} : vector<8x128xbf16>, vector<128x128xbf16>, vector<8x128xf32> -> vector<8x128xf32>
    %c0_3 = arith.constant 0 : index
    %c0_4 = arith.constant 0 : index
    %3 = vector.load %arg3[%c0_3, %c0_4] : memref<1x128xf32, #tpu.memory_space<vmem>>, vector<1x128xf32>
    %4 = vector.broadcast %3 : vector<1x128xf32> to vector<8x128xf32>
    %5 = arith.addf %2, %4 : vector<8x128xf32>
    %6 = math.tanh %5 : vector<8x128xf32>
    %c0_5 = arith.constant 0 : index
    %c0_6 = arith.constant 0 : index
    %7 = vector.load %arg4[%c0_5, %c0_6] : memref<8x128xf32, #tpu.memory_space<vmem>>, vector<8x128xf32>
    tpu.vector_store %arg4[%c0_5, %c0_6], %6 {strides = array<i32>} : memref<8x128xf32, #tpu.memory_space<vmem>>, vector<8x128xf32>,
    return
  }
  func.func @transform_0(%arg0: i32) -> (i32, i32) {
    %c0_i32 = arith.constant 0 : i32
    %c0_i32_0 = arith.constant 0 : i32
    return %arg0, %c0_i32 : i32, i32
  }
  func.func @transform_1(%arg0: i32) -> (i32, i32) {
    %c0_i32 = arith.constant 0 : i32
    %c0_i32_0 = arith.constant 0 : i32
    %c0_i32_1 = arith.constant 0 : i32
    return %c0_i32, %c0_i32_0 : i32, i32
  }
  func.func @transform_2(%arg0: i32) -> (i32, i32) {
    %c0_i32 = arith.constant 0 : i32
    %c0_i32_0 = arith.constant 0 : i32
    %c0_i32_1 = arith.constant 0 : i32
    return %c0_i32, %c0_i32_0 : i32, i32
  }
  func.func @transform_3(%arg0: i32) -> (i32, i32) {
    %c0_i32 = arith.constant 0 : i32
    %c0_i32_0 = arith.constant 0 : i32
    return %arg0, %c0_i32 : i32, i32
  }
}

module attributes {stable_mosaic.version = 11 : i64} {
  func.func @_pooler_kernel(%arg0: i32, %arg1: memref<8x128xbf16, #tpu.memory_space<vmem>>, %arg2: memref<128x128xbf16, #tpu.memory_space<vmem>>, %arg3: memref<1x128xf32, #tpu.memory_space<vmem>>, %arg4: memref<8x128xf32, #tpu.memory_space<vmem>>) attributes {dimension_semantics = [#tpu.dimension_semantics<parallel>], iteration_bounds = array<i64: 1>, scalar_prefetch = 0 : i64, scratch_operands = 0 : i64, tpu.core_type = #tpu.core_type<tc>, window_params = [{transform_indices = @transform_0, window_bounds = array<i64: 8, 128>}, {pipeline_mode = #tpu.pipeline_mode<synchronous>, transform_indices = @transform_1, window_bounds = array<i64: 128, 128>}, {pipeline_mode = #tpu.pipeline_mode<synchronous>, transform_indices = @transform_2, window_bounds = array<i64: 1, 128>}, {transform_indices = @transform_3, window_bounds = array<i64: 8, 128>}]} {
    %c0 = arith.constant 0 : index
    %c0_0 = arith.constant 0 : index
    %0 = vector.load %arg1[%c0, %c0_0] : memref<8x128xbf16, #tpu.memory_space<vmem>>, vector<8x128xbf16>
    %c0_1 = arith.constant 0 : index
    %c0_2 = arith.constant 0 : index
    %1 = vector.load %arg2[%c0_1, %c0_2] : memref<128x128xbf16, #tpu.memory_space<vmem>>, vector<128x128xbf16>
    %cst = arith.constant dense<0.000000e+00> : vector<8x128xf32>
    %2 = tpu.matmul %0, %1, %cst {dimension_numbers = #tpu.dot_dimension_numbers<[1], [1], [0], [0], [0, 0, 1, 0], [], []>} : vector<8x128xbf16>, vector<128x128xbf16>, vector<8x128xf32> -> vector<8x128xf32>
    %c0_3 = arith.constant 0 : index
    %c0_4 = arith.constant 0 : index
    %3 = vector.load %arg3[%c0_3, %c0_4] : memref<1x128xf32, #tpu.memory_space<vmem>>, vector<1x128xf32>
    %4 = vector.broadcast %3 : vector<1x128xf32> to vector<8x128xf32>
    %5 = arith.addf %2, %4 : vector<8x128xf32>
    %6 = math.tanh %5 : vector<8x128xf32>
    %c0_5 = arith.constant 0 : index
    %c0_6 = arith.constant 0 : index
    %7 = vector.load %arg4[%c0_5, %c0_6] : memref<8x128xf32, #tpu.memory_space<vmem>>, vector<8x128xf32>
    tpu.vector_store %arg4[%c0_5, %c0_6], %6 {strides = array<i32>} : memref<8x128xf32, #tpu.memory_space<vmem>>, vector<8x128xf32>,
    return
  }
  func.func @transform_0(%arg0: i32) -> (i32, i32) {
    %c0_i32 = arith.constant 0 : i32
    %c0_i32_0 = arith.constant 0 : i32
    return %arg0, %c0_i32 : i32, i32
  }
  func.func @transform_1(%arg0: i32) -> (i32, i32) {
    %c0_i32 = arith.constant 0 : i32
    %c0_i32_0 = arith.constant 0 : i32
    %c0_i32_1 = arith.constant 0 : i32
    return %c0_i32, %c0_i32_0 : i32, i32
  }
  func.func @transform_2(%arg0: i32) -> (i32, i32) {
    %c0_i32 = arith.constant 0 : i32
    %c0_i32_0 = arith.constant 0 : i32
    %c0_i32_1 = arith.constant 0 : i32
    return %c0_i32, %c0_i32_0 : i32, i32
  }
  func.func @transform_3(%arg0: i32) -> (i32, i32) {
    %c0_i32 = arith.constant 0 : i32
    %c0_i32_0 = arith.constant 0 : i32
    return %arg0, %c0_i32 : i32, i32
  }
}

</mosaic_0001>

<bundles_post_ra>
// kernel: tpu_custom_call.1
= control target key start
LH: loop header
LB: loop body
LE: loop exit
PB: predicated region body
PF: predicated region fallthrough
CT: control target
= control target key end

     0   :  { %8 = vsyncpa [#allocation3], 0  ;;  %s372_s0 = inlined_call_operand.hbm [shape: bf16[8,128], index: 0, kind: input, shape index: {}]   ;;  %s373_s1 = inlined_call_operand.hbm [shape: bf16[128,128], index: 1, kind: input, shape index: {}]   ;;  %s374_s2 = inlined_call_operand.vmem [shape: f32[1,128], index: 2, kind: input, shape index: {}]   ;;  %s375_s3 = inlined_call_operand.hbm [shape: f32[8,128], index: 3, kind: output, shape index: {}]  }
   0x1   :  { %9 = vsyncpa [#allocation6], 0 }
   0x2   :  { %10 = vsyncpa [#allocation4], 0  ;;  %s299_s12 = smov [#allocation2]   ;;  %s300_s14 = smov [#allocation5]  }
   0x3   :  { %s17_s13 = sshll.u32 %s299_s12, 4  ;;  %s26_s15 = sshll.u32 %s300_s14, 4  ;;  %s18_s13 = int_to_ptr.vmem [resolvable:$true] %s17_s13  ;;  %s326_s15 = int_to_ptr.vmem [resolvable:$true] %s26_s15 }
   0x4   :  { %s227_s18 = scalar_lea.hbm %s372_s0, 64 }
   0x5   :  { %p228_p0 = scmp.ne.s32.totalorder %s372_s0, %s227_s18  ;;  %p231_p1 = scmp.lt.u32.totalorder %s227_s18, %s372_s0 }
   0x7   :  { %p233_p2 = pnand %p231_p1, %p228_p0 }
   0x9   :  { %236 = shalt.err (!%p233_p2)
}
   0xa   :  { %s237_s23 = scalar_lea.vmem %s18_s13, 64  ;;  %p242_p4 = scmp.lt.s32.totalorder %s18_s13, %s18_s13 }
   0xb   :  { %p238_p3 = scmp.ne.s32.totalorder %s18_s13, %s237_s23  ;;  %p243_p5 = scmp.lt.s32.totalorder %s237_s23, %s237_s23 }
   0xd   :  { %p244_p6 = por %p243_p5, %p242_p4 }
   0xf   :  { %p245_p7 = pnand %p244_p6, %p238_p3 }
  0x11   :  { %248 = shalt.err (!%p245_p7)
}
  0x12   :  { %20 = dma.hbm_to_vmem [thread:$0]  %s372_s0, 64, %s18_s13, [#allocation3]  }
  0x13   :  { %s249_s28 = scalar_lea.hbm %s373_s1, 1024 }
  0x14   :  { %p250_p8 = scmp.ne.s32.totalorder %s373_s1, %s249_s28  ;;  %p253_p9 = scmp.lt.u32.totalorder %s249_s28, %s373_s1 }
  0x16   :  { %p255_p10 = pnand %p253_p9, %p250_p8 }
  0x18   :  { %258 = shalt.err (!%p255_p10)
}
  0x19   :  { %s259_s6 = scalar_lea.vmem %s326_s15, 1024  ;;  %p264_p12 = scmp.lt.s32.totalorder %s326_s15, %s326_s15 }
  0x1a   :  { %p260_p11 = scmp.ne.s32.totalorder %s326_s15, %s259_s6  ;;  %p265_p13 = scmp.lt.s32.totalorder %s259_s6, %s259_s6 }
  0x1c   :  { %p266_p0 = por %p265_p13, %p264_p12 }
  0x1e   :  { %p267_p1 = pnand %p266_p0, %p260_p11 }
  0x20   :  { %270 = shalt.err (!%p267_p1)
}
  0x21   :  { %s301_s0 = smov 64   ;;  %s302_s7 = smov 4  }
  0x22   :  { %32 = dma.hbm_to_vmem [thread:$0]  %s373_s1, 1024, %s326_s15, [#allocation6], %s301_s0, %s301_s0, %s302_s7  }
  0x23   :  { %293 = dma.done.wait [#allocation3], 64  }
  0x24   :  { %294 = vsyncadd [#allocation3], 4294967232 }
  0x25   :  { %295 = dma.done.wait [#allocation6], 1024  }
  0x26   :  { %296 = vsyncadd [#allocation6], 4294966272  ;;  %v303_v0 = vmov 0.0   ;;  %vm304_vm0 = vmmov 0   ;;  %v217_v1 = vld [vmem:[#allocation5] sm:$0xff]   ;;  %v218_v2 = vld [vmem:[#allocation5 + $0x8] sm:$0xff]  }
  0x27   :  { %190 = vmatprep.subr.bf16.mxu0 %v303_v0  ;;  %206 = vmatprep.mubr.msk.bf16.mxu0 %vm304_vm0, %v303_v0  ;;  %v219_v3 = vld [vmem:[#allocation5 + $0x10] sm:$0xff]   ;;  %v220_v4 = vld [vmem:[#allocation5 + $0x18] sm:$0xff]   ;;  %v221_v5 = vld [vmem:[#allocation5 + $0x20] sm:$0xff]   ;;  %s305_s11 = smov [#allocation7]  }
  0x28   :  { %191 = vmatpush3.bf16.xpose.msra.mxu0 %v217_v1  ;;  %v222_v6 = vld [vmem:[#allocation5 + $0x28] sm:$0xff]   ;;  %v223_v7 = vld [vmem:[#allocation5 + $0x30] sm:$0xff]   ;;  %v224_v8 = vld [vmem:[#allocation5 + $0x38] sm:$0xff]   ;;  %s162_s12 = sshll.u32 %s305_s11, 4  ;;  %s163_s12 = int_to_ptr.vmem [resolvable:$true] %s162_s12 }
  0x29   :  { %192 = vmatprep.subr.bf16.mxu0 %v303_v0  ;;  %v42_v9 = vld [vmem:[#allocation2] sm:$0xf]  ;;  %s271_s13 = scalar_lea.vmem %s163_s12, 128  ;;  %p276_p3 = scmp.lt.s32.totalorder %s163_s12, %s163_s12 }
  0x2a   :  { %v172_v10 = vld [vmem:[%s374_s2] ss:$0 sm:$0xff]  ;;  %p272_p2 = scmp.ne.s32.totalorder %s163_s12, %s271_s13  ;;  %p277_p4 = scmp.lt.s32.totalorder %s271_s13, %s271_s13 }
  0x2c   :  { %p278_p5 = por %p277_p4, %p276_p3 }
  0x2e   :  { %p279_p6 = pnand %p278_p5, %p272_p2 }
  0x30   :  { %193 = vmatpush3.bf16.xpose.msra.mxu0 %v218_v2 }
  0x31   :  { %194 = vmatprep.subr.bf16.mxu0 %v303_v0 }
  0x38   :  { %195 = vmatpush3.bf16.xpose.msra.mxu0 %v219_v3 }
  0x39   :  { %196 = vmatprep.subr.bf16.mxu0 %v303_v0 }
  0x40   :  { %197 = vmatpush3.bf16.xpose.msra.mxu0 %v220_v4 }
  0x41   :  { %198 = vmatprep.subr.bf16.mxu0 %v303_v0 }
  0x48   :  { %199 = vmatpush3.bf16.xpose.msra.mxu0 %v221_v5 }
  0x49   :  { %200 = vmatprep.subr.bf16.mxu0 %v303_v0 }
  0x50   :  { %201 = vmatpush3.bf16.xpose.msra.mxu0 %v222_v6 }
  0x51   :  { %202 = vmatprep.subr.bf16.mxu0 %v303_v0 }
  0x58   :  { %203 = vmatpush3.bf16.xpose.msra.mxu0 %v223_v7 }
  0x59   :  { %204 = vmatprep.subr.bf16.mxu0 %v303_v0 }
  0x60   :  { %205 = vmatpush3.bf16.xpose.msra.mxu0 %v224_v8 }
  0x67   :  { %207 = vmatmul.mubr.bf16.vlgmr.msra.gmra.mrb[0].mxu0 %v42_v9 }
 0x13a   :  { %v148_v11 = vpop.f32.mrb[0].mxu0 }
 0x13b   :  { %v149_v12 = vadd.f32 %v172_v10, %v148_v11  ;;  %v208_v13 = vpop.f32.mrb[1].mxu0 }
 0x13c   :  { %v151_v14 = vpop.f32.mrb[2].mxu0 }
 0x13d   :  { %225 = vtanh.f32 %v149_v12  ;;  %v209_v15 = vpop.f32.mrb[3].mxu0 }
 0x147   :  { %v226_v16 = vpop.eup %225 }
 0x148   :  { %155 = vst [vmem:[#allocation7] sm:$0xff] %v226_v16 }
 0x149   :  { %282 = shalt.err (!%p279_p6)
}
 0x14a   :  { %s283_s15 = scalar_lea.hbm %s375_s3, 128 }
 0x14b   :  { %p284_p7 = scmp.ne.s32.totalorder %s375_s3, %s283_s15  ;;  %p287_p8 = scmp.lt.u32.totalorder %s283_s15, %s375_s3 }
 0x14d   :  { %p289_p9 = pnand %p287_p8, %p284_p7 }
 0x14f   :  { %292 = shalt.err (!%p289_p9)
}
 0x150   :  { %165 = dma.vmem_to_hbm [thread:$0]  %s163_s12, 128, %s375_s3, [#allocation4]  }
 0x151   :  { %297 = dma.done.wait [#allocation4], 128  }
 0x152   :  { %298 = vsyncadd [#allocation4], 4294967168 }
 0x153   :  { %169 = vsyncpa [#allocation3], 1 }
 0x154   :  { %170 = vsyncpa [#allocation6], 1 }
 0x155   :  { %171 = vsyncpa [#allocation4], 1 }

// kernel: tpu_custom_call.1
= control target key start
LH: loop header
LB: loop body
LE: loop exit
PB: predicated region body
PF: predicated region fallthrough
CT: control target
= control target key end

     0   :  { %8 = vsyncpa [#allocation3], 0  ;;  %s372_s0 = inlined_call_operand.hbm [shape: bf16[8,128], index: 0, kind: input, shape index: {}]   ;;  %s373_s1 = inlined_call_operand.hbm [shape: bf16[128,128], index: 1, kind: input, shape index: {}]   ;;  %s374_s2 = inlined_call_operand.vmem [shape: f32[1,128], index: 2, kind: input, shape index: {}]   ;;  %s375_s3 = inlined_call_operand.hbm [shape: f32[8,128], index: 3, kind: output, shape index: {}]  }
   0x1   :  { %9 = vsyncpa [#allocation6], 0 }
   0x2   :  { %10 = vsyncpa [#allocation4], 0  ;;  %s299_s12 = smov [#allocation2]   ;;  %s300_s14 = smov [#allocation5]  }
   0x3   :  { %s17_s13 = sshll.u32 %s299_s12, 4  ;;  %s26_s15 = sshll.u32 %s300_s14, 4  ;;  %s18_s13 = int_to_ptr.vmem [resolvable:$true] %s17_s13  ;;  %s326_s15 = int_to_ptr.vmem [resolvable:$true] %s26_s15 }
   0x4   :  { %s227_s18 = scalar_lea.hbm %s372_s0, 64 }
   0x5   :  { %p228_p0 = scmp.ne.s32.totalorder %s372_s0, %s227_s18  ;;  %p231_p1 = scmp.lt.u32.totalorder %s227_s18, %s372_s0 }
   0x7   :  { %p233_p2 = pnand %p231_p1, %p228_p0 }
   0x9   :  { %236 = shalt.err (!%p233_p2)
}
   0xa   :  { %s237_s23 = scalar_lea.vmem %s18_s13, 64  ;;  %p242_p4 = scmp.lt.s32.totalorder %s18_s13, %s18_s13 }
   0xb   :  { %p238_p3 = scmp.ne.s32.totalorder %s18_s13, %s237_s23  ;;  %p243_p5 = scmp.lt.s32.totalorder %s237_s23, %s237_s23 }
   0xd   :  { %p244_p6 = por %p243_p5, %p242_p4 }
   0xf   :  { %p245_p7 = pnand %p244_p6, %p238_p3 }
  0x11   :  { %248 = shalt.err (!%p245_p7)
}
  0x12   :  { %20 = dma.hbm_to_vmem [thread:$0]  %s372_s0, 64, %s18_s13, [#allocation3]  }
  0x13   :  { %s249_s28 = scalar_lea.hbm %s373_s1, 1024 }
  0x14   :  { %p250_p8 = scmp.ne.s32.totalorder %s373_s1, %s249_s28  ;;  %p253_p9 = scmp.lt.u32.totalorder %s249_s28, %s373_s1 }
  0x16   :  { %p255_p10 = pnand %p253_p9, %p250_p8 }
  0x18   :  { %258 = shalt.err (!%p255_p10)
}
  0x19   :  { %s259_s6 = scalar_lea.vmem %s326_s15, 1024  ;;  %p264_p12 = scmp.lt.s32.totalorder %s326_s15, %s326_s15 }
  0x1a   :  { %p260_p11 = scmp.ne.s32.totalorder %s326_s15, %s259_s6  ;;  %p265_p13 = scmp.lt.s32.totalorder %s259_s6, %s259_s6 }
  0x1c   :  { %p266_p0 = por %p265_p13, %p264_p12 }
  0x1e   :  { %p267_p1 = pnand %p266_p0, %p260_p11 }
  0x20   :  { %270 = shalt.err (!%p267_p1)
}
  0x21   :  { %s301_s0 = smov 64   ;;  %s302_s7 = smov 4  }
  0x22   :  { %32 = dma.hbm_to_vmem [thread:$0]  %s373_s1, 1024, %s326_s15, [#allocation6], %s301_s0, %s301_s0, %s302_s7  }
  0x23   :  { %293 = dma.done.wait [#allocation3], 64  }
  0x24   :  { %294 = vsyncadd [#allocation3], 4294967232 }
  0x25   :  { %295 = dma.done.wait [#allocation6], 1024  }
  0x26   :  { %296 = vsyncadd [#allocation6], 4294966272  ;;  %v303_v0 = vmov 0.0   ;;  %vm304_vm0 = vmmov 0   ;;  %v217_v1 = vld [vmem:[#allocation5] sm:$0xff]   ;;  %v218_v2 = vld [vmem:[#allocation5 + $0x8] sm:$0xff]  }
  0x27   :  { %190 = vmatprep.subr.bf16.mxu0 %v303_v0  ;;  %206 = vmatprep.mubr.msk.bf16.mxu0 %vm304_vm0, %v303_v0  ;;  %v219_v3 = vld [vmem:[#allocation5 + $0x10] sm:$0xff]   ;;  %v220_v4 = vld [vmem:[#allocation5 + $0x18] sm:$0xff]   ;;  %v221_v5 = vld [vmem:[#allocation5 + $0x20] sm:$0xff]   ;;  %s305_s11 = smov [#allocation7]  }
  0x28   :  { %191 = vmatpush3.bf16.xpose.msra.mxu0 %v217_v1  ;;  %v222_v6 = vld [vmem:[#allocation5 + $0x28] sm:$0xff]   ;;  %v223_v7 = vld [vmem:[#allocation5 + $0x30] sm:$0xff]   ;;  %v224_v8 = vld [vmem:[#allocation5 + $0x38] sm:$0xff]   ;;  %s162_s12 = sshll.u32 %s305_s11, 4  ;;  %s163_s12 = int_to_ptr.vmem [resolvable:$true] %s162_s12 }
  0x29   :  { %192 = vmatprep.subr.bf16.mxu0 %v303_v0  ;;  %v42_v9 = vld [vmem:[#allocation2] sm:$0xf]  ;;  %s271_s13 = scalar_lea.vmem %s163_s12, 128  ;;  %p276_p3 = scmp.lt.s32.totalorder %s163_s12, %s163_s12 }
  0x2a   :  { %v172_v10 = vld [vmem:[%s374_s2] ss:$0 sm:$0xff]  ;;  %p272_p2 = scmp.ne.s32.totalorder %s163_s12, %s271_s13  ;;  %p277_p4 = scmp.lt.s32.totalorder %s271_s13, %s271_s13 }
  0x2c   :  { %p278_p5 = por %p277_p4, %p276_p3 }
  0x2e   :  { %p279_p6 = pnand %p278_p5, %p272_p2 }
  0x30   :  { %193 = vmatpush3.bf16.xpose.msra.mxu0 %v218_v2 }
  0x31   :  { %194 = vmatprep.subr.bf16.mxu0 %v303_v0 }
  0x38   :  { %195 = vmatpush3.bf16.xpose.msra.mxu0 %v219_v3 }
  0x39   :  { %196 = vmatprep.subr.bf16.mxu0 %v303_v0 }
  0x40   :  { %197 = vmatpush3.bf16.xpose.msra.mxu0 %v220_v4 }
  0x41   :  { %198 = vmatprep.subr.bf16.mxu0 %v303_v0 }
  0x48   :  { %199 = vmatpush3.bf16.xpose.msra.mxu0 %v221_v5 }
  0x49   :  { %200 = vmatprep.subr.bf16.mxu0 %v303_v0 }
  0x50   :  { %201 = vmatpush3.bf16.xpose.msra.mxu0 %v222_v6 }
  0x51   :  { %202 = vmatprep.subr.bf16.mxu0 %v303_v0 }
  0x58   :  { %203 = vmatpush3.bf16.xpose.msra.mxu0 %v223_v7 }
  0x59   :  { %204 = vmatprep.subr.bf16.mxu0 %v303_v0 }
  0x60   :  { %205 = vmatpush3.bf16.xpose.msra.mxu0 %v224_v8 }
  0x67   :  { %207 = vmatmul.mubr.bf16.vlgmr.msra.gmra.mrb[0].mxu0 %v42_v9 }
 0x13a   :  { %v148_v11 = vpop.f32.mrb[0].mxu0 }
 0x13b   :  { %v149_v12 = vadd.f32 %v172_v10, %v148_v11  ;;  %v208_v13 = vpop.f32.mrb[1].mxu0 }
 0x13c   :  { %v151_v14 = vpop.f32.mrb[2].mxu0 }
 0x13d   :  { %225 = vtanh.f32 %v149_v12  ;;  %v209_v15 = vpop.f32.mrb[3].mxu0 }
 0x147   :  { %v226_v16 = vpop.eup %225 }
 0x148   :  { %155 = vst [vmem:[#allocation7] sm:$0xff] %v226_v16 }
 0x149   :  { %282 = shalt.err (!%p279_p6)
}
 0x14a   :  { %s283_s15 = scalar_lea.hbm %s375_s3, 128 }
 0x14b   :  { %p284_p7 = scmp.ne.s32.totalorder %s375_s3, %s283_s15  ;;  %p287_p8 = scmp.lt.u32.totalorder %s283_s15, %s375_s3 }
 0x14d   :  { %p289_p9 = pnand %p287_p8, %p284_p7 }
 0x14f   :  { %292 = shalt.err (!%p289_p9)
}
 0x150   :  { %165 = dma.vmem_to_hbm [thread:$0]  %s163_s12, 128, %s375_s3, [#allocation4]  }
 0x151   :  { %297 = dma.done.wait [#allocation4], 128  }
 0x152   :  { %298 = vsyncadd [#allocation4], 4294967168 }
 0x153   :  { %169 = vsyncpa [#allocation3], 1 }
 0x154   :  { %170 = vsyncpa [#allocation6], 1 }
 0x155   :  { %171 = vsyncpa [#allocation4], 1 }

</bundles_post_ra>
